<compile_context>
chip_gen: v5e
topology: v5e:2x2
jax: 0.10.0
libtpu: 0.0.40
codegen_flags: <defaults>
</compile_context>

<pallas_src>
import functools

import jax
import jax.numpy as jnp
from jax.experimental import pallas as pl
from jax.experimental.pallas import tpu as pltpu

LANES = 128      # qubits live on the lane axis, zero-padded to 128
SUBLANES = 8     # rows 0-5 = batch samples, rows 6-7 = shared RY/RZ seed angles


# ----------------------------------------------------------------------------
# Bloch-vector single-qubit rotations (pure VPU/EUP elementwise math)
# ----------------------------------------------------------------------------
def _rot_x(bx, by, bz, th):
    c, s = jnp.cos(th), jnp.sin(th)
    return bx, by * c - bz * s, by * s + bz * c


def _rot_y(bx, by, bz, th):
    c, s = jnp.cos(th), jnp.sin(th)
    return bz * s + bx * c, by, bz * c - bx * s


def _rot_z(bx, by, bz, th):
    c, s = jnp.cos(th), jnp.sin(th)
    return bx * c - by * s, bx * s + by * c, bz


# ----------------------------------------------------------------------------
# Pallas kernel: batched QCBM circuit surrogate (the hot path)
# ----------------------------------------------------------------------------
def qcbm_kernel(nlayers, dyn_ref, stat_ref, out_ref):
    # TODO(synk): exact tensorcircuit `quantum_circuit_Noise` body is not in the provided
    # source; this is a mean-field (product-state) surrogate with matching parameter
    # shapes (nlayers x nqubits x 4 rotations + noise, nqubits x 3 final) and data flow.
    dyn = dyn_ref[...]            # [8, 128] single load
    stat = stat_ref[...]          # [4*nlayers+3 padded, 128] single load

    ax = dyn                      # rows 6,7 compute garbage; wrapper slices [:6, :nq]
    ay = dyn[6:7, :]              # [1, 128] -> broadcasts over the 8 sublanes
    az = dyn[7:8, :]

    bx = jnp.zeros_like(dyn)
    by = jnp.zeros_like(dyn)
    bz = jnp.ones_like(dyn)       # |0> state: <Z> = 1

    # Data (angle) encoding: RX(inputs) RY(seed_a) RZ(seed_b), per qubit, per sample.
    bx, by, bz = _rot_x(bx, by, bz, ax)
    bx, by, bz = _rot_y(bx, by, bz, ay)
    bx, by, bz = _rot_z(bx, by, bz, az)

    # Parameterized layers: static unroll, in-register slices of the one loaded slab.
    for l in range(nlayers):
        p = stat[4 * l:4 * l + 4, :]                 # [4, 128]
        bx, by, bz = _rot_x(bx, by, bz, p[0:1, :])
        bx, by, bz = _rot_y(bx, by, bz, p[1:2, :])
        bx, by, bz = _rot_z(bx, by, bz, p[2:3, :])
        noise = p[3:4, :]
        shrink = jnp.exp(-noise * noise)             # depolarizing-style shrink
        bx, by, bz = bx * shrink, by * shrink, bz * shrink

    # Final per-qubit rotation layer (q_weights_final).
    wf = stat[4 * nlayers:4 * nlayers + 3, :]        # [3, 128]
    bx, by, bz = _rot_x(bx, by, bz, wf[0:1, :])
    bx, by, bz = _rot_y(bx, by, bz, wf[1:2, :])
    bx, by, bz = _rot_z(bx, by, bz, wf[2:3, :])

    # Lane-dense full-block store (unmasked vst, one aligned writeback DMA).
    out_ref[...] = bz.astype(out_ref.dtype)


def qcbm_expectations(dyn_slab, static_slab, nlayers):
    """Gridless whole-array VMEM call: 2 input DMAs + 1 lane-dense output DMA."""
    return pl.pallas_call(
        functools.partial(qcbm_kernel, nlayers),
        out_shape=jax.ShapeDtypeStruct((SUBLANES, LANES), jnp.float32),
        in_specs=[
            pl.BlockSpec(memory_space=pltpu.MemorySpace.VMEM),
            pl.BlockSpec(memory_space=pltpu.MemorySpace.VMEM),
        ],
        out_specs=pl.BlockSpec(memory_space=pltpu.MemorySpace.VMEM),
    )(dyn_slab, static_slab)


# ----------------------------------------------------------------------------
# Forward glue (jitted, mirrors the torch 's' path)
# ----------------------------------------------------------------------------
@functools.partial(jax.jit, static_argnames=("nq", "nlayers"))
def _forward(inputs, seed_key, static_slab, nq, nlayers):
    # torch: reshape -> cat([inputs, rand(1, 2nq).repeat(6,1)]) -> circuit -> reshape [1,120]
    x = jnp.reshape(inputs.astype(jnp.float32), (6, nq))
    seeds = jax.random.uniform(seed_key, (2, nq), dtype=jnp.float32)   # shared by all 6 rows
    dyn = jnp.zeros((SUBLANES, LANES), jnp.float32)
    dyn = dyn.at[:6, :nq].set(x)
    dyn = dyn.at[6:8, :nq].set(seeds)
    expec = qcbm_expectations(dyn, static_slab, nlayers)               # [8, 128]
    return jnp.reshape(expec[:6, :nq], (1, 6 * nq))                    # [1, 6*nq]


class EnsembleQCBMSingle:
    def __init__(self, n_heads, nqubits, nlayers, measurement_setting="s", key=None):
        assert nqubits <= LANES
        self.n_heads = n_heads
        self.nqubits = nqubits
        self.nlayers = nlayers
        self.measurement_setting = measurement_setting
        k1, k2 = jax.random.split(key)
        # QCBMPrior.__init__: params ~ 0.1*randn([nlayers, nqubits, 4]),
        #                     q_weights_final ~ 0.1*randn([nqubits, 3])
        self.params = 0.1 * jax.random.normal(k1, (nlayers, nqubits, 4), jnp.float32)
        self.q_weights_final = 0.1 * jax.random.normal(k2, (nqubits, 3), jnp.float32)

        # Pre-pack the static parameter slab ONCE (no per-call transposes / extra DMAs).
        rows = 4 * nlayers + 3
        rpad = ((rows + SUBLANES - 1) // SUBLANES) * SUBLANES
        slab = jnp.zeros((rpad, LANES), jnp.float32)
        p_t = jnp.transpose(self.params, (0, 2, 1)).reshape(4 * nlayers, nqubits)
        slab = slab.at[:4 * nlayers, :nqubits].set(p_t)
        slab = slab.at[4 * nlayers:rows, :nqubits].set(self.q_weights_final.T)
        self.static_slab = slab

    def __call__(self, inputs, temperature, seed_key):
        assert self.measurement_setting == "s"
        # TODO(synk): `temperature` is also unused by the torch 's'/'d' path (returns expec_obs).
        return _forward(inputs, seed_key, self.static_slab,
                        nq=self.nqubits, nlayers=self.nlayers)


if __name__ == "__main__":
    key = jax.random.PRNGKey(0)
    k_param, k_in, k_seed = jax.random.split(key, 3)

    nqubits = 20    # 6 * nqubits = 120, matching the torch reshape([1, 120])
    nlayers = 3
    n_heads = 6

    model = EnsembleQCBMSingle(n_heads, nqubits, nlayers,
                               measurement_setting="s", key=k_param)

    inputs = jax.random.normal(k_in, (1, 6 * nqubits), jnp.float32)   # 120 elements
    out = model(inputs, temperature=1.0, seed_key=k_seed)
    out = jax.block_until_ready(out)

    assert out.shape == (1, 120)
    assert out.dtype == jnp.float32
    assert bool(jnp.all(jnp.isfinite(out)))
    assert bool(jnp.all(jnp.abs(out) <= 1.0 + 1e-5))  # Pauli-Z expectations
    print("KERNEL_OK")
</pallas_src>

<mosaic_0001>
module attributes {stable_mosaic.version = 11 : i64} {
  func.func @qcbm_kernel(%arg0: memref<8x128xf32, #tpu.memory_space<vmem>>, %arg1: memref<16x128xf32, #tpu.memory_space<vmem>>, %arg2: memref<8x128xf32, #tpu.memory_space<vmem>>) attributes {dimension_semantics = [], scalar_prefetch = 0 : i64, scratch_operands = 0 : i64, tpu.core_type = #tpu.core_type<tc>} {
    %c0 = arith.constant 0 : index
    %c0_0 = arith.constant 0 : index
    %0 = vector.load %arg0[%c0, %c0_0] : memref<8x128xf32, #tpu.memory_space<vmem>>, vector<8x128xf32>
    %c0_1 = arith.constant 0 : index
    %c0_2 = arith.constant 0 : index
    %1 = vector.load %arg1[%c0_1, %c0_2] : memref<16x128xf32, #tpu.memory_space<vmem>>, vector<16x128xf32>
    %2 = vector.extract_strided_slice %0 {offsets = [6, 0], sizes = [1, 128], strides = [1, 1]} : vector<8x128xf32> to vector<1x128xf32>
    %3 = vector.extract_strided_slice %0 {offsets = [7, 0], sizes = [1, 128], strides = [1, 1]} : vector<8x128xf32> to vector<1x128xf32>
    %cst = arith.constant 0.000000e+00 : f32
    %4 = vector.broadcast %cst : f32 to vector<8x128xf32>
    %cst_3 = arith.constant 0.000000e+00 : f32
    %5 = vector.broadcast %cst_3 : f32 to vector<8x128xf32>
    %cst_4 = arith.constant 1.000000e+00 : f32
    %6 = vector.broadcast %cst_4 : f32 to vector<8x128xf32>
    %7 = math.cos %0 : vector<8x128xf32>
    %8 = math.sin %0 : vector<8x128xf32>
    %9 = arith.mulf %5, %7 : vector<8x128xf32>
    %10 = arith.mulf %6, %8 : vector<8x128xf32>
    %11 = arith.subf %9, %10 : vector<8x128xf32>
    %12 = arith.mulf %5, %8 : vector<8x128xf32>
    %13 = arith.mulf %6, %7 : vector<8x128xf32>
    %14 = arith.addf %12, %13 : vector<8x128xf32>
    %15 = math.cos %2 : vector<1x128xf32>
    %16 = math.sin %2 : vector<1x128xf32>
    %17 = vector.broadcast %16 : vector<1x128xf32> to vector<8x128xf32>
    %18 = arith.mulf %14, %17 : vector<8x128xf32>
    %19 = vector.broadcast %15 : vector<1x128xf32> to vector<8x128xf32>
    %20 = arith.mulf %4, %19 : vector<8x128xf32>
    %21 = arith.addf %18, %20 : vector<8x128xf32>
    %22 = vector.broadcast %15 : vector<1x128xf32> to vector<8x128xf32>
    %23 = arith.mulf %14, %22 : vector<8x128xf32>
    %24 = vector.broadcast %16 : vector<1x128xf32> to vector<8x128xf32>
    %25 = arith.mulf %4, %24 : vector<8x128xf32>
    %26 = arith.subf %23, %25 : vector<8x128xf32>
    %27 = math.cos %3 : vector<1x128xf32>
    %28 = math.sin %3 : vector<1x128xf32>
    %29 = vector.broadcast %27 : vector<1x128xf32> to vector<8x128xf32>
    %30 = arith.mulf %21, %29 : vector<8x128xf32>
    %31 = vector.broadcast %28 : vector<1x128xf32> to vector<8x128xf32>
    %32 = arith.mulf %11, %31 : vector<8x128xf32>
    %33 = arith.subf %30, %32 : vector<8x128xf32>
    %34 = vector.broadcast %28 : vector<1x128xf32> to vector<8x128xf32>
    %35 = arith.mulf %21, %34 : vector<8x128xf32>
    %36 = vector.broadcast %27 : vector<1x128xf32> to vector<8x128xf32>
    %37 = arith.mulf %11, %36 : vector<8x128xf32>
    %38 = arith.addf %35, %37 : vector<8x128xf32>
    %39 = vector.extract_strided_slice %1 {offsets = [0, 0], sizes = [4, 128], strides = [1, 1]} : vector<16x128xf32> to vector<4x128xf32>
    %40 = vector.extract_strided_slice %39 {offsets = [0, 0], sizes = [1, 128], strides = [1, 1]} : vector<4x128xf32> to vector<1x128xf32>
    %41 = math.cos %40 : vector<1x128xf32>
    %42 = math.sin %40 : vector<1x128xf32>
    %43 = vector.broadcast %41 : vector<1x128xf32> to vector<8x128xf32>
    %44 = arith.mulf %38, %43 : vector<8x128xf32>
    %45 = vector.broadcast %42 : vector<1x128xf32> to vector<8x128xf32>
    %46 = arith.mulf %26, %45 : vector<8x128xf32>
    %47 = arith.subf %44, %46 : vector<8x128xf32>
    %48 = vector.broadcast %42 : vector<1x128xf32> to vector<8x128xf32>
    %49 = arith.mulf %38, %48 : vector<8x128xf32>
    %50 = vector.broadcast %41 : vector<1x128xf32> to vector<8x128xf32>
    %51 = arith.mulf %26, %50 : vector<8x128xf32>
    %52 = arith.addf %49, %51 : vector<8x128xf32>
    %53 = vector.extract_strided_slice %39 {offsets = [1, 0], sizes = [1, 128], strides = [1, 1]} : vector<4x128xf32> to vector<1x128xf32>
    %54 = math.cos %53 : vector<1x128xf32>
    %55 = math.sin %53 : vector<1x128xf32>
    %56 = vector.broadcast %55 : vector<1x128xf32> to vector<8x128xf32>
    %57 = arith.mulf %52, %56 : vector<8x128xf32>
    %58 = vector.broadcast %54 : vector<1x128xf32> to vector<8x128xf32>
    %59 = arith.mulf %33, %58 : vector<8x128xf32>
    %60 = arith.addf %57, %59 : vector<8x128xf32>
    %61 = vector.broadcast %54 : vector<1x128xf32> to vector<8x128xf32>
    %62 = arith.mulf %52, %61 : vector<8x128xf32>
    %63 = vector.broadcast %55 : vector<1x128xf32> to vector<8x128xf32>
    %64 = arith.mulf %33, %63 : vector<8x128xf32>
    %65 = arith.subf %62, %64 : vector<8x128xf32>
    %66 = vector.extract_strided_slice %39 {offsets = [2, 0], sizes = [1, 128], strides = [1, 1]} : vector<4x128xf32> to vector<1x128xf32>
    %67 = math.cos %66 : vector<1x128xf32>
    %68 = math.sin %66 : vector<1x128xf32>
    %69 = vector.broadcast %67 : vector<1x128xf32> to vector<8x128xf32>
    %70 = arith.mulf %60, %69 : vector<8x128xf32>
    %71 = vector.broadcast %68 : vector<1x128xf32> to vector<8x128xf32>
    %72 = arith.mulf %47, %71 : vector<8x128xf32>
    %73 = arith.subf %70, %72 : vector<8x128xf32>
    %74 = vector.broadcast %68 : vector<1x128xf32> to vector<8x128xf32>
    %75 = arith.mulf %60, %74 : vector<8x128xf32>
    %76 = vector.broadcast %67 : vector<1x128xf32> to vector<8x128xf32>
    %77 = arith.mulf %47, %76 : vector<8x128xf32>
    %78 = arith.addf %75, %77 : vector<8x128xf32>
    %79 = vector.extract_strided_slice %39 {offsets = [3, 0], sizes = [1, 128], strides = [1, 1]} : vector<4x128xf32> to vector<1x128xf32>
    %cst_5 = arith.constant 0.000000e+00 : f32
    %80 = vector.broadcast %cst_5 : f32 to vector<1x128xf32>
    %81 = arith.subf %80, %79 : vector<1x128xf32>
    %82 = arith.mulf %81, %79 : vector<1x128xf32>
    %83 = math.exp %82 : vector<1x128xf32>
    %84 = vector.broadcast %83 : vector<1x128xf32> to vector<8x128xf32>
    %85 = arith.mulf %73, %84 : vector<8x128xf32>
    %86 = vector.broadcast %83 : vector<1x128xf32> to vector<8x128xf32>
    %87 = arith.mulf %78, %86 : vector<8x128xf32>
    %88 = vector.broadcast %83 : vector<1x128xf32> to vector<8x128xf32>
    %89 = arith.mulf %65, %88 : vector<8x128xf32>
    %90 = vector.extract_strided_slice %1 {offsets = [4, 0], sizes = [4, 128], strides = [1, 1]} : vector<16x128xf32> to vector<4x128xf32>
    %91 = vector.extract_strided_slice %90 {offsets = [0, 0], sizes = [1, 128], strides = [1, 1]} : vector<4x128xf32> to vector<1x128xf32>
    %92 = math.cos %91 : vector<1x128xf32>
    %93 = math.sin %91 : vector<1x128xf32>
    %94 = vector.broadcast %92 : vector<1x128xf32> to vector<8x128xf32>
    %95 = arith.mulf %87, %94 : vector<8x128xf32>
    %96 = vector.broadcast %93 : vector<1x128xf32> to vector<8x128xf32>
    %97 = arith.mulf %89, %96 : vector<8x128xf32>
    %98 = arith.subf %95, %97 : vector<8x128xf32>
    %99 = vector.broadcast %93 : vector<1x128xf32> to vector<8x128xf32>
    %100 = arith.mulf %87, %99 : vector<8x128xf32>
    %101 = vector.broadcast %92 : vector<1x128xf32> to vector<8x128xf32>
    %102 = arith.mulf %89, %101 : vector<8x128xf32>
    %103 = arith.addf %100, %102 : vector<8x128xf32>
    %104 = vector.extract_strided_slice %90 {offsets = [1, 0], sizes = [1, 128], strides = [1, 1]} : vector<4x128xf32> to vector<1x128xf32>
    %105 = math.cos %104 : vector<1x128xf32>
    %106 = math.sin %104 : vector<1x128xf32>
    %107 = vector.broadcast %106 : vector<1x128xf32> to vector<8x128xf32>
    %108 = arith.mulf %103, %107 : vector<8x128xf32>
    %109 = vector.broadcast %105 : vector<1x128xf32> to vector<8x128xf32>
    %110 = arith.mulf %85, %109 : vector<8x128xf32>
    %111 = arith.addf %108, %110 : vector<8x128xf32>
    %112 = vector.broadcast %105 : vector<1x128xf32> to vector<8x128xf32>
    %113 = arith.mulf %103, %112 : vector<8x128xf32>
    %114 = vector.broadcast %106 : vector<1x128xf32> to vector<8x128xf32>
    %115 = arith.mulf %85, %114 : vector<8x128xf32>
    %116 = arith.subf %113, %115 : vector<8x128xf32>
    %117 = vector.extract_strided_slice %90 {offsets = [2, 0], sizes = [1, 128], strides = [1, 1]} : vector<4x128xf32> to vector<1x128xf32>
    %118 = math.cos %117 : vector<1x128xf32>
    %119 = math.sin %117 : vector<1x128xf32>
    %120 = vector.broadcast %118 : vector<1x128xf32> to vector<8x128xf32>
    %121 = arith.mulf %111, %120 : vector<8x128xf32>
    %122 = vector.broadcast %119 : vector<1x128xf32> to vector<8x128xf32>
    %123 = arith.mulf %98, %122 : vector<8x128xf32>
    %124 = arith.subf %121, %123 : vector<8x128xf32>
    %125 = vector.broadcast %119 : vector<1x128xf32> to vector<8x128xf32>
    %126 = arith.mulf %111, %125 : vector<8x128xf32>
    %127 = vector.broadcast %118 : vector<1x128xf32> to vector<8x128xf32>
    %128 = arith.mulf %98, %127 : vector<8x128xf32>
    %129 = arith.addf %126, %128 : vector<8x128xf32>
    %130 = vector.extract_strided_slice %90 {offsets = [3, 0], sizes = [1, 128], strides = [1, 1]} : vector<4x128xf32> to vector<1x128xf32>
    %cst_6 = arith.constant 0.000000e+00 : f32
    %131 = vector.broadcast %cst_6 : f32 to vector<1x128xf32>
    %132 = arith.subf %131, %130 : vector<1x128xf32>
    %133 = arith.mulf %132, %130 : vector<1x128xf32>
    %134 = math.exp %133 : vector<1x128xf32>
    %135 = vector.broadcast %134 : vector<1x128xf32> to vector<8x128xf32>
    %136 = arith.mulf %124, %135 : vector<8x128xf32>
    %137 = vector.broadcast %134 : vector<1x128xf32> to vector<8x128xf32>
    %138 = arith.mulf %129, %137 : vector<8x128xf32>
    %139 = vector.broadcast %134 : vector<1x128xf32> to vector<8x128xf32>
    %140 = arith.mulf %116, %139 : vector<8x128xf32>
    %141 = vector.extract_strided_slice %1 {offsets = [8, 0], sizes = [4, 128], strides = [1, 1]} : vector<16x128xf32> to vector<4x128xf32>
    %142 = vector.extract_strided_slice %141 {offsets = [0, 0], sizes = [1, 128], strides = [1, 1]} : vector<4x128xf32> to vector<1x128xf32>
    %143 = math.cos %142 : vector<1x128xf32>
    %144 = math.sin %142 : vector<1x128xf32>
    %145 = vector.broadcast %143 : vector<1x128xf32> to vector<8x128xf32>
    %146 = arith.mulf %138, %145 : vector<8x128xf32>
    %147 = vector.broadcast %144 : vector<1x128xf32> to vector<8x128xf32>
    %148 = arith.mulf %140, %147 : vector<8x128xf32>
    %149 = arith.subf %146, %148 : vector<8x128xf32>
    %150 = vector.broadcast %144 : vector<1x128xf32> to vector<8x128xf32>
    %151 = arith.mulf %138, %150 : vector<8x128xf32>
    %152 = vector.broadcast %143 : vector<1x128xf32> to vector<8x128xf32>
    %153 = arith.mulf %140, %152 : vector<8x128xf32>
    %154 = arith.addf %151, %153 : vector<8x128xf32>
    %155 = vector.extract_strided_slice %141 {offsets = [1, 0], sizes = [1, 128], strides = [1, 1]} : vector<4x128xf32> to vector<1x128xf32>
    %156 = math.cos %155 : vector<1x128xf32>
    %157 = math.sin %155 : vector<1x128xf32>
    %158 = vector.broadcast %157 : vector<1x128xf32> to vector<8x128xf32>
    %159 = arith.mulf %154, %158 : vector<8x128xf32>
    %160 = vector.broadcast %156 : vector<1x128xf32> to vector<8x128xf32>
    %161 = arith.mulf %136, %160 : vector<8x128xf32>
    %162 = arith.addf %159, %161 : vector<8x128xf32>
    %163 = vector.broadcast %156 : vector<1x128xf32> to vector<8x128xf32>
    %164 = arith.mulf %154, %163 : vector<8x128xf32>
    %165 = vector.broadcast %157 : vector<1x128xf32> to vector<8x128xf32>
    %166 = arith.mulf %136, %165 : vector<8x128xf32>
    %167 = arith.subf %164, %166 : vector<8x128xf32>
    %168 = vector.extract_strided_slice %141 {offsets = [2, 0], sizes = [1, 128], strides = [1, 1]} : vector<4x128xf32> to vector<1x128xf32>
    %169 = math.cos %168 : vector<1x128xf32>
    %170 = math.sin %168 : vector<1x128xf32>
    %171 = vector.broadcast %169 : vector<1x128xf32> to vector<8x128xf32>
    %172 = arith.mulf %162, %171 : vector<8x128xf32>
    %173 = vector.broadcast %170 : vector<1x128xf32> to vector<8x128xf32>
    %174 = arith.mulf %149, %173 : vector<8x128xf32>
    %175 = arith.subf %172, %174 : vector<8x128xf32>
    %176 = vector.broadcast %170 : vector<1x128xf32> to vector<8x128xf32>
    %177 = arith.mulf %162, %176 : vector<8x128xf32>
    %178 = vector.broadcast %169 : vector<1x128xf32> to vector<8x128xf32>
    %179 = arith.mulf %149, %178 : vector<8x128xf32>
    %180 = arith.addf %177, %179 : vector<8x128xf32>
    %181 = vector.extract_strided_slice %141 {offsets = [3, 0], sizes = [1, 128], strides = [1, 1]} : vector<4x128xf32> to vector<1x128xf32>
    %cst_7 = arith.constant 0.000000e+00 : f32
    %182 = vector.broadcast %cst_7 : f32 to vector<1x128xf32>
    %183 = arith.subf %182, %181 : vector<1x128xf32>
    %184 = arith.mulf %183, %181 : vector<1x128xf32>
    %185 = math.exp %184 : vector<1x128xf32>
    %186 = vector.broadcast %185 : vector<1x128xf32> to vector<8x128xf32>
    %187 = arith.mulf %175, %186 : vector<8x128xf32>
    %188 = vector.broadcast %185 : vector<1x128xf32> to vector<8x128xf32>
    %189 = arith.mulf %180, %188 : vector<8x128xf32>
    %190 = vector.broadcast %185 : vector<1x128xf32> to vector<8x128xf32>
    %191 = arith.mulf %167, %190 : vector<8x128xf32>
    %192 = vector.extract_strided_slice %1 {offsets = [12, 0], sizes = [3, 128], strides = [1, 1]} : vector<16x128xf32> to vector<3x128xf32>
    %193 = vector.extract_strided_slice %192 {offsets = [0, 0], sizes = [1, 128], strides = [1, 1]} : vector<3x128xf32> to vector<1x128xf32>
    %194 = math.cos %193 : vector<1x128xf32>
    %195 = math.sin %193 : vector<1x128xf32>
    %196 = vector.broadcast %195 : vector<1x128xf32> to vector<8x128xf32>
    %197 = arith.mulf %189, %196 : vector<8x128xf32>
    %198 = vector.broadcast %194 : vector<1x128xf32> to vector<8x128xf32>
    %199 = arith.mulf %191, %198 : vector<8x128xf32>
    %200 = arith.addf %197, %199 : vector<8x128xf32>
    %201 = vector.extract_strided_slice %192 {offsets = [1, 0], sizes = [1, 128], strides = [1, 1]} : vector<3x128xf32> to vector<1x128xf32>
    %202 = math.cos %201 : vector<1x128xf32>
    %203 = math.sin %201 : vector<1x128xf32>
    %204 = vector.broadcast %202 : vector<1x128xf32> to vector<8x128xf32>
    %205 = arith.mulf %200, %204 : vector<8x128xf32>
    %206 = vector.broadcast %203 : vector<1x128xf32> to vector<8x128xf32>
    %207 = arith.mulf %187, %206 : vector<8x128xf32>
    %208 = arith.subf %205, %207 : vector<8x128xf32>
    %c0_8 = arith.constant 0 : index
    %c0_9 = arith.constant 0 : index
    %209 = vector.load %arg2[%c0_8, %c0_9] : memref<8x128xf32, #tpu.memory_space<vmem>>, vector<8x128xf32>
    tpu.vector_store %arg2[%c0_8, %c0_9], %208 {strides = array<i32>} : memref<8x128xf32, #tpu.memory_space<vmem>>, vector<8x128xf32>,
    return
  }
}

</mosaic_0001>

<bundles_post_ra>
// kernel: _forward.1
= control target key start
LH: loop header
LB: loop body
LE: loop exit
PB: predicated region body
PF: predicated region fallthrough
CT: control target
= control target key end

     0   :  { %v1097_v23 = vmov 683565275   ;;  %v1098_v25 = vmov 2475754826   ;;  %v1099_v27 = vmov 2131351028   ;;  %s1486_s0 = inlined_call_operand.vmem [shape: f32[8,128], index: 0, kind: input, shape index: {}]   ;;  %s1487_s1 = inlined_call_operand.vmem [shape: f32[16,128], index: 1, kind: input, shape index: {}]   ;;  %s1488_s2 = inlined_call_operand.vmem [shape: f32[8,128], index: 2, kind: output, shape index: {}]  }
   0x1   :  { %v1122_v0 = vld [vmem:[%s1486_s0] sm:$0xff]  ;;  %v1100_v29 = vmov 2102212464   ;;  %v1101_v31 = vmov 920167782  }
   0x2   :  { %v1127_v1 = vld [vmem:[%s1487_s1] sm:$0xff]  ;;  %v14_v2 = vand.u32 2147483647, %v1122_v0  ;;  %v17_v3 = vand.u32 2139095040, %v1122_v0  ;;  %v1102_v40 = vmov 1326507024  }
   0x3   :  { %v343_v4 = vand.u32 2147483647, %v1127_v1  ;;  %v346_v5 = vand.u32 2139095040, %v1127_v1 }
   0x4   :  { %v18_v6 = vshrl.u32 %v17_v3, 23  ;;  %v21_v7 = vand.u32 8388607, %v14_v2 }
   0x5   :  { %v347_v8 = vshrl.u32 %v346_v5, 23  ;;  %v350_v12 = vand.u32 8388607, %v343_v4 }
   0x6   :  { %v1068_v9 = vadd.s32 4294967169, %v18_v6  ;;  %v22_v10 = vor.u32 8388608, %v21_v7 }
   0x7   :  { %v1074_v11 = vadd.s32 4294967169, %v347_v8  ;;  %v351_v17 = vor.u32 8388608, %v350_v12 }
   0x8   :  { %v24_v13 = vadd.s32 1, %v1068_v9  ;;  %v1137_v16 = vshll.u32 %v22_v10, 8 }
   0x9   :  { %v353_v14 = vadd.s32 1, %v1074_v11  ;;  %v1149_v34 = vshll.u32 %v351_v17, 8 }
   0xa   :  { %vm25_vm0 = vcmp.gt.s32.totalorder %v24_v13, 0  ;;  %v63_v33 = vand.u32 65535, %v1137_v16  ;;  %v64_v38 = vshrl.u32 %v1137_v16, 16 }
   0xb   :  { %v26_v15 = vsel %vm25_vm0, %v24_v13, 0  ;;  %vm354_vm1 = vcmp.gt.s32.totalorder %v353_v14, 0 }
   0xc   :  { %v28_v18 = vand.u32 31, %v26_v15  ;;  %v355_v19 = vsel %vm354_vm1, %v353_v14, 0  ;;  %v1139_v20 = vshrl.u32 %v26_v15, 5 }
   0xd   :  { %v1141_v21 = vand.u32 31, %v355_v19  ;;  %v1169_v51 = vshrl.u32 %v355_v19, 5 }
   0xe   :  { %v29_v22 = vsub.s32 32, %v28_v18  ;;  %v31_v24 = vshll.u32 %v1097_v23, %v28_v18  ;;  %v34_v26 = vshll.u32 %v1098_v25, %v28_v18  ;;  %v37_v28 = vshll.u32 %v1099_v27, %v28_v18 }
   0xf   :  { %v40_v30 = vshll.u32 %v1100_v29, %v28_v18  ;;  %v43_v32 = vshll.u32 %v1101_v31, %v28_v18  ;;  %vm46_vm2 = vcmp.lt.s32.totalorder %v1139_v20, 1  ;;  %vm49_vm3 = vcmp.lt.s32.totalorder %v1139_v20, 4 }
  0x10   :  { %v32_v35 = vshrl.u32 %v1098_v25, %v29_v22  ;;  %v35_v36 = vshrl.u32 %v1099_v27, %v29_v22  ;;  %v38_v37 = vshrl.u32 %v1100_v29, %v29_v22  ;;  %v41_v39 = vshrl.u32 %v1101_v31, %v29_v22 }
  0x11   :  { %v44_v41 = vshrl.u32 %v1102_v40, %v29_v22  ;;  %v1160_v45 = vsub.s32 32, %v1141_v21  ;;  %v30_v46 = vshrl.u32 %v1097_v23, %v29_v22  ;;  %vm48_vm4 = vcmp.lt.s32.totalorder %v1139_v20, 3 }
  0x12   :  { %v33_v42 = vor.u32 %v32_v35, %v31_v24  ;;  %v36_v43 = vor.u32 %v35_v36, %v34_v26  ;;  %v39_v44 = vor.u32 %v38_v37, %v37_v28  ;;  %v42_v47 = vor.u32 %v41_v39, %v40_v30 }
  0x13   :  { %v45_v48 = vor.u32 %v44_v41, %v43_v32  ;;  %vm47_vm5 = vcmp.lt.s32.totalorder %v1139_v20, 2  ;;  %v360_v54 = vshll.u32 %v1097_v23, %v1141_v21  ;;  %v363_v55 = vshll.u32 %v1098_v25, %v1141_v21 }
  0x14   :  { %v54_v49 = vsel %vm46_vm2, %v33_v42, %v36_v43  ;;  %v58_v50 = vsel %vm46_vm2, %v36_v43, %v39_v44  ;;  %v55_v52 = vsel %vm49_vm3, %v42_v47, 920167782  ;;  %v51_v56 = vsel %vm49_vm3, %v39_v44, 2102212464 }
  0x15   :  { %v59_v53 = vsel %vm49_vm3, %v45_v48, 1326507024  ;;  %v56_v57 = vsel %vm48_vm4, %v39_v44, %v55_v52  ;;  %v361_v59 = vshrl.u32 %v1098_v25, %v1160_v45  ;;  %v50_v60 = vsel %vm46_vm2, %v30_v46, %v33_v42 }
  0x16   :  { %v60_v58 = vsel %vm48_vm4, %v42_v47, %v59_v53  ;;  %v57_v61 = vsel %vm47_vm5, %v54_v49, %v56_v57  ;;  %v364_v63 = vshrl.u32 %v1099_v27, %v1160_v45  ;;  %v52_v8 = vsel %vm48_vm4, %v36_v43, %v51_v56 }
  0x17   :  { %v61_v62 = vsel %vm47_vm5, %v58_v50, %v60_v58  ;;  %v87_v6 = vand.u32 65535, %v57_v61  ;;  %v88_v7 = vshrl.u32 %v57_v61, 16  ;;  %v1197_v9 = vor.u32 %v361_v59, %v360_v54 }
  0x18   :  { %v65_v3 = vand.u32 65535, %v61_v62  ;;  %v66_v5 = vshrl.u32 %v61_v62, 16  ;;  %v1199_v10 = vor.u32 %v364_v63, %v363_v55  ;;  %v366_v11 = vshll.u32 %v1099_v27, %v1141_v21 }
  0x19   :  { %v367_v15 = vshrl.u32 %v1100_v29, %v1160_v45  ;;  %v89_v18 = vmul.u32 %v87_v6, %v63_v33  ;;  %v90_v19 = vmul.u32 %v88_v7, %v63_v33  ;;  %v91_v22 = vmul.u32 %v87_v6, %v64_v38 }
  0x1a   :  { %v67_v12 = vmul.u32 %v65_v3, %v63_v33  ;;  %v68_v13 = vmul.u32 %v66_v5, %v63_v33  ;;  %v69_v14 = vmul.u32 %v65_v3, %v64_v38  ;;  %v70_v17 = vmul.u32 %v66_v5, %v64_v38 }
  0x1b   :  { %v92_v30 = vmul.u32 %v88_v7, %v64_v38  ;;  %v93_v35 = vshll.u32 %v90_v19, 16  ;;  %v94_v36 = vshrl.u32 %v90_v19, 16  ;;  %v95_v37 = vshll.u32 %v91_v22, 16 }
  0x1c   :  { %v71_v24 = vshll.u32 %v68_v13, 16  ;;  %v72_v26 = vshrl.u32 %v68_v13, 16  ;;  %v73_v28 = vshll.u32 %v69_v14, 16  ;;  %v74_v32 = vshrl.u32 %v69_v14, 16 }
  0x1d   :  { %v96_v41 = vshrl.u32 %v91_v22, 16  ;;  %v369_v42 = vshll.u32 %v1100_v29, %v1141_v21  ;;  %v1103_v43 = vmov 0   ;;  %vm97_vm7 = vc.u32 %v89_v18, %v93_v35 }
  0x1e   :  { %vm75_vm6 = vc.u32 %v67_v12, %v71_v24  ;;  %v77_v39 = vadd.s32 %v71_v24, %v67_v12  ;;  %v99_v33 = vadd.s32 %v93_v35, %v89_v18  ;;  %v370_v46 = vshrl.u32 %v1101_v31, %v1160_v45 }
  0x1f   :  { %v76_v44 = vsel %vm75_vm6, 1, %v1103_v43  ;;  %v98_v38 = vsel %vm97_vm7, 1, %v1103_v43  ;;  %v372_v48 = vshll.u32 %v1101_v31, %v1141_v21  ;;  %v368_v52 = vor.u32 %v367_v15, %v366_v11 }
  0x20   :  { %v78_v47 = vadd.s32 %v76_v44, %v70_v17  ;;  %vm79_vm8 = vc.u32 %v77_v39, %v73_v28  ;;  %v100_v50 = vadd.s32 %v98_v38, %v92_v30  ;;  %vm101_vm9 = vc.u32 %v99_v33, %v95_v37 }
  0x21   :  { %v80_v49 = vsel %vm79_vm8, 1, %v1103_v43  ;;  %v102_v54 = vsel %vm101_vm9, 1, %v1103_v43  ;;  %v371_v55 = vor.u32 %v370_v46, %v369_v42  ;;  %v373_v56 = vshrl.u32 %v1102_v40, %v1160_v45 }
  0x22   :  { %v82_v53 = vadd.s32 %v80_v49, %v78_v47  ;;  %v1217_v57 = vadd.s32 %v99_v33, %v95_v37  ;;  %v104_v58 = vadd.s32 %v102_v54, %v100_v50  ;;  %vm375_vm10 = vcmp.lt.s32.totalorder %v1169_v51, 1  ;;  %v1261_v50 = vld [vmem:[%s1487_s1 + $0x8] sm:$0xff] }
  0x23   :  { %vm377_vm11 = vcmp.lt.s32.totalorder %v1169_v51, 3  ;;  %v374_v59 = vor.u32 %v373_v56, %v372_v48  ;;  %vm376_vm12 = vcmp.lt.s32.totalorder %v1169_v51, 2  ;;  %vm378_vm13 = vcmp.lt.s32.totalorder %v1169_v51, 4 }
  0x24   :  { %v83_v21 = vadd.s32 %v82_v53, %v72_v26  ;;  %v53_v61 = vsel %vm47_vm5, %v50_v60, %v52_v8  ;;  %v105_v62 = vadd.s32 %v104_v58, %v94_v36  ;;  %v383_v63 = vsel %vm375_vm10, %v1197_v9, %v1199_v10 }
  0x25   :  { %v384_v3 = vsel %vm378_vm13, %v371_v55, 920167782  ;;  %v387_v7 = vsel %vm375_vm10, %v1199_v10, %v368_v52  ;;  %v393_v20 = vshrl.u32 %v1149_v34, 16  ;;  %v388_v11 = vsel %vm378_vm13, %v374_v59, 1326507024 }
  0x26   :  { %v1231_v5 = vadd.s32 %v83_v21, %v74_v32  ;;  %v385_v6 = vsel %vm377_vm11, %v368_v52, %v384_v3  ;;  %v106_v60 = vadd.s32 %v105_v62, %v96_v41  ;;  %v392_v12 = vand.u32 65535, %v1149_v34 }
  0x27   :  { %v386_v8 = vsel %vm376_vm12, %v383_v63, %v385_v6  ;;  %v107_v13 = vmul.u32 %v1137_v16, %v53_v61  ;;  %v389_v14 = vsel %vm377_vm11, %v371_v55, %v388_v11  ;;  %v359_v30 = vshrl.u32 %v1097_v23, %v1160_v45 }
  0x28   :  { %vm109_vm14 = vc.u32 %v1231_v5, %v1217_v57  ;;  %v416_v15 = vand.u32 65535, %v386_v8  ;;  %v110_v17 = vadd.s32 1, %v106_v60  ;;  %v390_v18 = vsel %vm376_vm12, %v387_v7, %v389_v14 }
  0x29   :  { %v417_v19 = vshrl.u32 %v386_v8, 16  ;;  %v394_v22 = vand.u32 65535, %v390_v18  ;;  %v395_v24 = vshrl.u32 %v390_v18, 16  ;;  %v380_v41 = vsel %vm378_vm13, %v368_v52, 2102212464 }
  0x2a   :  { %v420_v26 = vmul.u32 %v416_v15, %v393_v20  ;;  %v111_v28 = vsel %vm109_vm14, %v110_v17, %v106_v60  ;;  %v418_v16 = vmul.u32 %v416_v15, %v392_v12  ;;  %v379_v45 = vsel %vm375_vm10, %v359_v30, %v1197_v9 }
  0x2b   :  { %v419_v32 = vmul.u32 %v417_v19, %v392_v12  ;;  %v112_v35 = vadd.s32 %v111_v28, %v107_v13  ;;  %v396_v36 = vmul.u32 %v394_v22, %v392_v12  ;;  %v397_v37 = vmul.u32 %v395_v24, %v392_v12 }
  0x2c   :  { %v398_v39 = vmul.u32 %v394_v22, %v393_v20  ;;  %v421_v42 = vmul.u32 %v417_v19, %v393_v20  ;;  %v424_v33 = vshll.u32 %v420_v26, 16  ;;  %v399_v47 = vmul.u32 %v395_v24, %v393_v20 }
  0x2d   :  { %v422_v44 = vshll.u32 %v419_v32, 16  ;;  %v113_v46 = vadd.s32 536870912, %v112_v35  ;;  %v400_v38 = vshll.u32 %v397_v37, 16  ;;  %v381_v55 = vsel %vm377_vm11, %v1199_v10, %v380_v41 }
  0x2e   :  { %v402_v48 = vshll.u32 %v398_v39, 16  ;;  %v401_v21 = vshrl.u32 %v397_v37, 16  ;;  %v423_v62 = vshrl.u32 %v419_v32, 16  ;;  %v715_v3 = vand.u32 2139095040, %v1261_v50 }
  0x2f   :  { %vm426_vm15 = vc.u32 %v418_v16, %v422_v44  ;;  %v428_v49 = vadd.s32 %v422_v44, %v418_v16  ;;  %v1263_v53 = vshrl.u32 %v113_v46, 30  ;;  %vm404_vm0 = vc.u32 %v396_v36, %v400_v38 }
  0x30   :  { %v406_v52 = vadd.s32 %v400_v38, %v396_v36  ;;  %v427_v54 = vsel %vm426_vm15, 1, %v1103_v43  ;;  %v405_v56 = vsel %vm404_vm0, 1, %v1103_v43  ;;  %v403_v7 = vshrl.u32 %v398_v39, 16 }
  0x31   :  { %v429_v9 = vadd.s32 %v427_v54, %v421_v42  ;;  %vm430_vm1 = vc.u32 %v428_v49, %v424_v33  ;;  %v115_v58 = vshll.u32 %v1263_v53, 30  ;;  %v407_v59 = vadd.s32 %v405_v56, %v399_v47 }
  0x32   :  { %vm408_vm2 = vc.u32 %v406_v52, %v402_v48  ;;  %v431_v63 = vsel %vm430_vm1, 1, %v1103_v43  ;;  %v425_v60 = vshrl.u32 %v420_v26, 16  ;;  %v716_v8 = vshrl.u32 %v715_v3, 23 }
  0x33   :  { %v409_v61 = vsel %vm408_vm2, 1, %v1103_v43  ;;  %v116_v6 = vsub.s32 %v112_v35, %v115_v58  ;;  %v433_v10 = vadd.s32 %v431_v63, %v429_v9  ;;  %v1274_v13 = vadd.s32 %v428_v49, %v424_v33 }
  0x34   :  { %v411_v20 = vadd.s32 %v409_v61, %v407_v59  ;;  %v382_v14 = vsel %vm376_vm12, %v379_v45, %v381_v55  ;;  %v1080_v17 = vadd.s32 4294967169, %v716_v8  ;;  %v108_v32 = vadd.s32 %v1217_v57, %v1231_v5 }
  0x35   :  { %vm117_vm3 = vcmp.lt.s32.totalorder %v116_v6, 0  ;;  %v118_v11 = vsub.s32 0, %v116_v6  ;;  %v434_v15 = vadd.s32 %v433_v10, %v423_v62  ;;  %v436_v30 = vmul.u32 %v1149_v34, %v382_v14 }
  0x36   :  { %v412_v12 = vadd.s32 %v411_v20, %v401_v21  ;;  %v722_v28 = vadd.s32 1, %v1080_v17  ;;  %v712_v34 = vand.u32 2147483647, %v1261_v50  ;;  %v138_v57 = vsub.s32 4, %v1263_v53 }
  0x37   :  { %v119_v18 = vsel %vm117_vm3, %v118_v11, %v116_v6  ;;  %v435_v24 = vadd.s32 %v434_v15, %v425_v60  ;;  %vm16_vm7 = vcmp.lt.s32.totalorder %v1122_v0, 0  ;;  %vm15_vm9 = vcmp.le.f32.partialorder %v14_v2, 0.7853982 }
  0x38   :  { %v413_v19 = vadd.s32 %v412_v12, %v403_v7  ;;  %v120_v22 = vclz %v119_v18  ;;  %vm723_vm5 = vcmp.gt.s32.totalorder %v722_v28, 0  ;;  %v719_v54 = vand.u32 8388607, %v712_v34 }
  0x39   :  { %v439_v16 = vadd.s32 1, %v435_v24  ;;  %v724_v42 = vsel %vm723_vm5, %v722_v28, 0  ;;  %v139_v21 = vsel %vm16_vm7, %v138_v57, %v1263_v53  ;;  %vm345_vm15 = vcmp.lt.s32.totalorder %v1127_v1, 0 }
  0x3a   :  { %vm438_vm4 = vc.u32 %v413_v19, %v1274_v13  ;;  %v1069_v26 = vadd.s32 4294967294, %v120_v22  ;;  %v726_v38 = vand.u32 31, %v724_v42  ;;  %v1296_v61 = vshrl.u32 %v724_v42, 5 }
  0x3b   :  { %v440_v51 = vsel %vm438_vm4, %v439_v16, %v435_v24  ;;  %v720_v63 = vor.u32 8388608, %v719_v54  ;;  %v141_v12 = vsel %vm15_vm9, 0, %v139_v21  ;;  %v437_v15 = vadd.s32 %v1274_v13, %v413_v19 }
  0x3c   :  { %vm1070_vm6 = vcmp.lt.s32.totalorder %v1069_v26, 0  ;;  %v441_v36 = vadd.s32 %v440_v51, %v436_v30  ;;  %v1289_v55 = vsub.s32 32, %v726_v38  ;;  %v741_v58 = vshll.u32 %v1101_v31, %v726_v38 }
  0x3d   :  { %v123_v35 = vsel %vm1070_vm6, 0, %v1069_v26  ;;  %v732_v3 = vshll.u32 %v1098_v25, %v726_v38  ;;  %v735_v10 = vshll.u32 %v1099_v27, %v726_v38  ;;  %v738_v14 = vshll.u32 %v1100_v29, %v726_v38 }
  0x3e   :  { %v124_v37 = vsub.s32 32, %v123_v35  ;;  %v125_v39 = vshll.u32 %v116_v6, %v123_v35  ;;  %v128_v41 = vsub.s32 4294967266, %v123_v35  ;;  %v442_v44 = vadd.s32 536870912, %v441_v36 }
  0x3f   :  { %v742_v6 = vshrl.u32 %v1102_v40, %v1289_v55  ;;  %v733_v20 = vshrl.u32 %v1099_v27, %v1289_v55  ;;  %v736_v53 = vshrl.u32 %v1100_v29, %v1289_v55  ;;  %v739_v40 = vshrl.u32 %v1101_v31, %v1289_v55 }
  0x40   :  { %v126_v33 = vshrl.u32 %v108_v32, %v124_v37  ;;  %v129_v46 = vadd.s32 127, %v128_v41  ;;  %v1283_v47 = vshrl.u32 %v442_v44, 30  ;;  %vm747_vm10 = vcmp.lt.s32.totalorder %v1296_v61, 4 }
  0x41   :  { %v743_v11 = vor.u32 %v742_v6, %v741_v58  ;;  %v1315_v18 = vshll.u32 %v720_v63, 8  ;;  %v1318_v22 = vor.u32 %v733_v20, %v732_v3  ;;  %v1320_v24 = vor.u32 %v736_v53, %v735_v10 }
  0x42   :  { %v127_v48 = vor.u32 %v126_v33, %v125_v39  ;;  %v130_v45 = vshll.u32 %v129_v46, 23  ;;  %v444_v5 = vshll.u32 %v1283_v47, 30  ;;  %vm744_vm11 = vcmp.lt.s32.totalorder %v1296_v61, 1 }
  0x43   :  { %vm746_vm13 = vcmp.lt.s32.totalorder %v1296_v61, 3  ;;  %v757_v31 = vsel %vm747_vm10, %v743_v11, 1326507024  ;;  %v729_v13 = vshll.u32 %v1097_v23, %v726_v38  ;;  %v740_v19 = vor.u32 %v739_v40, %v738_v14 }
  0x44   :  { %v131_v49 = vor.u32 4788187, %v130_v45  ;;  %v134_v52 = vcvt.s32.f32 %v127_v48  ;;  %v445_v56 = vsub.s32 %v441_v36, %v444_v5  ;;  %vm745_vm14 = vcmp.lt.s32.totalorder %v1296_v61, 2 }
  0x45   :  { %v730_v35 = vshrl.u32 %v1098_v25, %v1289_v55  ;;  %v756_v36 = vsel %vm744_vm11, %v1318_v22, %v1320_v24  ;;  %v758_v37 = vsel %vm746_vm13, %v740_v19, %v757_v31  ;;  %v312_v44 = vadd.s32 3, %v141_v12 }
  0x46   :  { %v132_v9 = vand.u32 2147483647, %v131_v49  ;;  %vm446_vm8 = vcmp.lt.s32.totalorder %v445_v56, 0  ;;  %v447_v59 = vsub.s32 0, %v445_v56  ;;  %v759_v45 = vsel %vm745_vm14, %v756_v36, %v758_v37 }
  0x47   :  { %v1338_v57 = vor.u32 %v730_v35, %v729_v13  ;;  %v1341_v5 = vand.u32 65535, %v1315_v18  ;;  %v1344_v49 = vshrl.u32 %v1315_v18, 16  ;;  %v763_v21 = vand.u32 65535, %v759_v45 }
  0x48   :  { %v135_v62 = vmul.f32 %v134_v52, %v132_v9  ;;  %v448_v7 = vsel %vm446_vm8, %v447_v59, %v445_v56  ;;  %v764_v59 = vshrl.u32 %v759_v45, 16  ;;  %v313_v3 = vand.u32 3, %v312_v44 }
  0x49   :  { %v449_v8 = vclz %v448_v7  ;;  %v752_v7 = vsel %vm744_vm11, %v1338_v57, %v1318_v22  ;;  %v467_v11 = vsub.s32 4, %v1283_v47  ;;  %v765_v40 = vmul.u32 %v763_v21, %v1341_v5 }
  0x4a   :  { %v136_v60 = vxor.u32 2147483648, %v135_v62  ;;  %v1356_v10 = vmul.u32 %v764_v59, %v1341_v5  ;;  %vm315_vm0 = vcmp.eq.s32.totalorder %v313_v3, 0  ;;  %vm318_vm1 = vcmp.eq.s32.totalorder %v313_v3, 2 }
  0x4b   :  { %v1075_v17 = vadd.s32 4294967294, %v449_v8  ;;  %v158_v8 = vand.u32 3, %v141_v12  ;;  %vm1369_vm2 = vcmp.le.f32.partialorder %v343_v4, 0.7853982  ;;  %vm314_vm4 = vcmp.lt.s32.totalorder %v313_v3, 2 }
  0x4c   :  { %v137_v27 = vsel %vm16_vm7, %v136_v60, %v135_v62  ;;  %vm157_vm7 = vweird.f32 %v1122_v0  ;;  %v768_v37 = vmul.u32 %v764_v59, %v1344_v49 }
  0x4d   :  { %v140_v2 = vsel %vm15_vm9, %v1122_v0, %v137_v27  ;;  %vm1076_vm12 = vcmp.lt.s32.totalorder %v1075_v17, 0  ;;  %v1361_v27 = vmul.u32 %v763_v21, %v1344_v49  ;;  %vm163_vm3 = vcmp.eq.s32.totalorder %v158_v8, 2 }
  0x4e   :  { %v142_v29 = vmul.f32 %v140_v2, %v140_v2  ;;  %v452_v28 = vsel %vm1076_vm12, 0, %v1075_v17  ;;  %vm160_vm6 = vcmp.eq.s32.totalorder %v158_v8, 0  ;;  %vm159_vm8 = vcmp.lt.s32.totalorder %v158_v8, 2 }
  0x4f   :  { %v453_v16 = vsub.s32 32, %v452_v28  ;;  %v454_v32 = vshll.u32 %v445_v56, %v452_v28  ;;  %v457_v51 = vsub.s32 4294967266, %v452_v28  ;;  %v753_v56 = vsel %vm747_vm10, %v740_v19, 920167782 }
  0x50   :  { %v143_v30 = vmul.f32 -0.001358992, %v142_v29  ;;  %v150_v26 = vmul.f32 -0.00019511016, %v142_v29  ;;  %v754_v20 = vsel %vm746_vm13, %v1320_v24, %v753_v56 }
  0x51   :  { %v455_v42 = vshrl.u32 %v437_v15, %v453_v16  ;;  %v458_v33 = vadd.s32 127, %v457_v51  ;;  %v769_v15 = vshll.u32 %v1356_v10, 16  ;;  %v755_v31 = vsel %vm745_vm14, %v752_v7, %v754_v20 }
  0x52   :  { %v144_v39 = vadd.f32 0.041655596, %v143_v30  ;;  %v151_v41 = vadd.f32 0.008332121, %v150_v26  ;;  %v771_v30 = vshll.u32 %v1361_v27, 16  ;;  %v786_v16 = vshrl.u32 %v755_v31, 16 }
  0x53   :  { %v456_v48 = vor.u32 %v455_v42, %v454_v32  ;;  %v459_v25 = vshll.u32 %v458_v33, 23  ;;  %v775_v26 = vadd.s32 %v769_v15, %v765_v40  ;;  %vm773_vm5 = vc.u32 %v765_v40, %v769_v15 }
  0x54   :  { %v145_v46 = vmul.f32 %v144_v39, %v142_v29  ;;  %v152_v38 = vmul.f32 %v151_v41, %v142_v29  ;;  %v785_v36 = vand.u32 65535, %v755_v31  ;;  %v774_v42 = vsel %vm773_vm5, 1, %v1103_v43 }
  0x55   :  { %v460_v9 = vor.u32 4788187, %v459_v25  ;;  %v463_v58 = vcvt.s32.f32 %v456_v48  ;;  %vm1385_vm9 = vc.u32 %v775_v26, %v771_v30  ;;  %v788_v48 = vmul.u32 %v786_v16, %v1341_v5 }
  0x56   :  { %v146_v52 = vadd.f32 -0.4999988, %v145_v46  ;;  %v153_v54 = vadd.f32 -0.16666654, %v152_v38  ;;  %v787_v21 = vmul.u32 %v785_v36, %v1341_v5 }
  0x57   :  { %v461_v6 = vand.u32 2147483647, %v460_v9  ;;  %v791_v7 = vshll.u32 %v788_v48, 16 }
  0x58   :  { %v147_v62 = vmul.f32 %v146_v52, %v142_v29  ;;  %v154_v63 = vmul.f32 %v153_v54, %v142_v29  ;;  %v728_v52 = vshrl.u32 %v1097_v23, %v1289_v55  ;;  %v1395_v54 = vmul.u32 %v785_v36, %v1344_v49 }
  0x59   :  { %v464_v14 = vmul.f32 %v463_v58, %v461_v6  ;;  %v778_v23 = vsel %vm1385_vm9, 1, %v1103_v43  ;;  %v790_v6 = vmul.u32 %v786_v16, %v1344_v49  ;;  %v797_v40 = vadd.s32 %v791_v7, %v787_v21 }
  0x5a   :  { %v148_v53 = vadd.f32 1.0, %v147_v62  ;;  %v155_v60 = vadd.f32 1.0, %v154_v63  ;;  %v749_v62 = vsel %vm747_vm10, %v1320_v24, 2102212464  ;;  %v776_v63 = vadd.s32 %v774_v42, %v768_v37 }
  0x5b   :  { %v465_v28 = vxor.u32 2147483648, %v464_v14  ;;  %vm795_vm10 = vc.u32 %v787_v21, %v791_v7 }
  0x5c   :  { %v156_v17 = vmul.f32 %v155_v60, %v140_v2  ;;  %v164_v29 = vxor.u32 2147483648, %v148_v53  ;;  %v468_v2 = vsel %vm345_vm15, %v467_v11, %v1283_v47  ;;  %v770_v11 = vshrl.u32 %v1356_v10, 16 }
  0x5d   :  { %v466_v19 = vsel %vm345_vm15, %v465_v28, %v464_v14  ;;  %v470_v47 = vsel %vm1369_vm2, 0, %v468_v2  ;;  %v780_v14 = vadd.s32 %v778_v23, %v776_v63  ;;  %v796_v49 = vsel %vm795_vm10, 1, %v1103_v43 }
  0x5e   :  { %v161_v13 = vxor.u32 2147483648, %v156_v17  ;;  %v320_v51 = vsel %vm318_vm1, %v164_v29, %v156_v17  ;;  %v469_v4 = vsel %vm1369_vm2, %v1127_v1, %v466_v19  ;;  %v165_v39 = vsel %vm163_vm3, %v164_v29, %v156_v17 }
  0x5f   :  { %v471_v35 = vmul.f32 %v469_v4, %v469_v4  ;;  %v1390_v45 = vand.u32 3, %v470_v47  ;;  %v641_v25 = vadd.s32 3, %v470_v47  ;;  %v798_v31 = vadd.s32 %v796_v49, %v790_v6 }
  0x60   :  { %v317_v32 = vsel %vm315_vm0, %v148_v53, %v161_v13  ;;  %v162_v33 = vsel %vm160_vm6, %v148_v53, %v161_v13  ;;  %v793_v53 = vshll.u32 %v1395_v54, 16  ;;  %v792_v28 = vshrl.u32 %v788_v48, 16 }
  0x61   :  { %v321_v41 = vsel %vm314_vm4, %v317_v32, %v320_v51  ;;  %v472_v46 = vmul.f32 -0.001358992, %v471_v35  ;;  %v479_v38 = vmul.f32 -0.00019511016, %v471_v35  ;;  %v166_v59 = vsel %vm159_vm8, %v162_v33, %v165_v39 }
  0x62   :  { %v1399_v56 = vsel %vm157_vm7, nan, %v321_v41  ;;  %vm489_vm12 = vcmp.eq.s32.totalorder %v1390_v45, 0  ;;  %v642_v5 = vand.u32 3, %v641_v25  ;;  %v1415_v24 = vsel %vm157_vm7, nan, %v166_v59 }
  0x63   :  { %v473_v9 = vadd.f32 0.041655596, %v472_v46  ;;  %v480_v58 = vadd.f32 0.008332121, %v479_v38  ;;  %v325_v20 = vmul.f32 0.0, %v1399_v56  ;;  %v327_v15 = vperm.slane %v1399_v56, 6 }
  0x64   :  { %v329_v0 = vperm.slane %v1415_v24, 6  ;;  %vm799_vm15 = vc.u32 %v797_v40, %v793_v53  ;;  %vm492_vm0 = vcmp.eq.s32.totalorder %v1390_v45, 2  ;;  %vm644_vm1 = vcmp.eq.s32.totalorder %v642_v5, 0 }
  0x65   :  { %v474_v55 = vmul.f32 %v473_v9, %v471_v35  ;;  %v481_v3 = vmul.f32 %v480_v58, %v471_v35  ;;  %v326_v12 = vadd.f32 %v325_v20, %v1415_v24  ;;  %v800_v10 = vsel %vm799_vm15, 1, %v1103_v43 }
  0x66   :  { %vm647_vm2 = vcmp.eq.s32.totalorder %v642_v5, 2  ;;  %v772_v19 = vshrl.u32 %v1361_v27, 16  ;;  %v802_v30 = vadd.s32 %v800_v10, %v798_v31  ;;  %v323_v26 = vmul.f32 0.0, %v1415_v24 }
  0x67   :  { %v475_v60 = vadd.f32 -0.4999988, %v474_v55  ;;  %v482_v8 = vadd.f32 -0.16666654, %v481_v3  ;;  %v794_v51 = vshrl.u32 %v1395_v54, 16  ;;  %v330_v36 = vmul.f32 0.0, %v329_v0 }
  0x68   :  { %v781_v47 = vadd.s32 %v780_v14, %v770_v11  ;;  %v803_v37 = vadd.s32 %v802_v30, %v792_v28  ;;  %vm488_vm3 = vcmp.lt.s32.totalorder %v1390_v45, 2  ;;  %v748_v43 = vsel %vm744_vm11, %v728_v52, %v1338_v57 }
  0x69   :  { %v476_v17 = vmul.f32 %v475_v60, %v471_v35  ;;  %v483_v29 = vmul.f32 %v482_v8, %v471_v35  ;;  %v328_v35 = vmul.f32 %v327_v15, %v326_v12  ;;  %v750_v27 = vsel %vm746_vm13, %v1318_v22, %v749_v62 }
  0x6a   :  { %v337_v41 = vperm.slane %v1399_v56, 7  ;;  %vm643_vm4 = vcmp.lt.s32.totalorder %v642_v5, 2  ;;  %v804_v57 = vadd.s32 %v803_v37, %v794_v51  ;;  %v324_v38 = vsub.f32 %v323_v26, %v1399_v56 }
  0x6b   :  { %v477_v13 = vadd.f32 1.0, %v476_v17  ;;  %v484_v2 = vadd.f32 1.0, %v483_v29  ;;  %v331_v48 = vadd.f32 %v330_v36, %v328_v35  ;;  %v782_v22 = vadd.s32 %v781_v47, %v772_v19 }
  0x6c   :  { %v801_v25 = vadd.s32 %v797_v40, %v793_v53  ;;  %vm486_vm11 = vweird.f32 %v1127_v1  ;;  %v751_v9 = vsel %vm745_vm14, %v748_v43, %v750_v27  ;;  %v333_v58 = vmul.f32 0.0, %v327_v15 }
  0x6d   :  { %v485_v16 = vmul.f32 %v484_v2, %v469_v4  ;;  %v493_v32 = vxor.u32 2147483648, %v477_v13  ;;  %v335_v4 = vperm.slane %v1415_v24, 7  ;;  %v808_v21 = vadd.s32 1, %v804_v57 }
  0x6e   :  { %v332_v59 = vmul.f32 %v329_v0, %v326_v12  ;;  %v340_v62 = vmul.f32 %v337_v41, %v331_v48  ;;  %vm807_vm13 = vc.u32 %v782_v22, %v801_v25  ;;  %v805_v55 = vmul.u32 %v1315_v18, %v751_v9 }
  0x6f   :  { %v490_v39 = vxor.u32 2147483648, %v485_v16  ;;  %v494_v42 = vsel %vm492_vm0, %v493_v32, %v485_v16  ;;  %v649_v46 = vsel %vm647_vm2, %v493_v32, %v485_v16  ;;  %v341_v63 = vmul.f32 %v335_v4, %v324_v38 }
  0x70   :  { %v809_v3 = vsel %vm807_vm13, %v808_v21, %v804_v57  ;;  %v334_v6 = vsub.f32 %v332_v59, %v333_v58  ;;  %v676_v5 = vsub.f32 0.0, %v1127_v1  ;;  %v336_v24 = vmul.f32 %v335_v4, %v331_v48 }
  0x71   :  { %v491_v44 = vsel %vm489_vm12, %v477_v13, %v490_v39  ;;  %v646_v33 = vsel %vm644_vm1, %v477_v13, %v490_v39  ;;  %v342_v45 = vadd.f32 %v341_v63, %v340_v62  ;;  %v810_v20 = vadd.s32 %v809_v3, %v805_v55 }
  0x72   :  { %v495_v52 = vsel %vm488_vm3, %v491_v44, %v494_v42  ;;  %v650_v54 = vsel %vm643_vm4, %v646_v33, %v649_v46  ;;  %v338_v60 = vmul.f32 %v337_v41, %v324_v38  ;;  %v677_v49 = vmul.f32 %v676_v5, %v1127_v1 }
  0x73   :  { %v1448_v23 = vsel %vm486_vm11, nan, %v495_v52  ;;  %v1450_v56 = vsel %vm486_vm11, nan, %v650_v54  ;;  %v811_v53 = vadd.s32 536870912, %v810_v20  ;;  %v806_v36 = vadd.s32 %v801_v25, %v782_v22 }
  0x74   :  { %v652_v7 = vperm.slane %v1448_v23, 0  ;;  %v654_v61 = vperm.slane %v1450_v56, 0  ;;  %v339_v40 = vsub.f32 %v336_v24, %v338_v60  ;;  %v660_v17 = vperm.slane %v1450_v56, 1 }
  0x75   :  { %v1456_v14 = vshrl.u32 %v811_v53, 30  ;;  %v662_v29 = vperm.slane %v1448_v23, 1  ;;  %v678_v12 = vmul.f32 1.442695, %v677_v49  ;;  %v668_v16 = vperm.slane %v1448_v23, 2 }
  0x76   :  { %v657_v8 = vmul.f32 %v654_v61, %v342_v45  ;;  %v658_v11 = vmul.f32 %v652_v7, %v334_v6  ;;  %v653_v28 = vmul.f32 %v652_v7, %v342_v45  ;;  %v655_v13 = vmul.f32 %v654_v61, %v334_v6 }
  0x77   :  { %v813_v18 = vshll.u32 %v1456_v14, 30  ;;  %v663_v10 = vmul.f32 %v662_v29, %v339_v40  ;;  %1093 = vpow2.f32 %v678_v12  ;;  %v670_v32 = vperm.slane %v1450_v56, 2 }
  0x78   :  { %v659_v15 = vadd.f32 %v658_v11, %v657_v8  ;;  %v656_v1 = vsub.f32 %v653_v28, %v655_v13  ;;  %v666_v35 = vmul.f32 %v660_v17, %v339_v40  ;;  %v684_v22 = vperm.slane %v1448_v23, 4 }
  0x79   :  { %v814_v31 = vsub.s32 %v810_v20, %v813_v18  ;;  %v686_v25 = vperm.slane %v1450_v56, 4  ;;  %vm714_vm6 = vcmp.lt.s32.totalorder %v1261_v50, 0  ;;  %v836_v7 = vsub.s32 4, %v1456_v14 }
  0x7a   :  { %v661_v2 = vmul.f32 %v660_v17, %v659_v15  ;;  %v665_v47 = vmul.f32 %v662_v29, %v659_v15  ;;  %v674_v39 = vmul.f32 %v668_v16, %v656_v1  ;;  %v671_v21 = vmul.f32 %v670_v32, %v656_v1 }
  0x7b   :  { %vm815_vm14 = vcmp.lt.s32.totalorder %v814_v31, 0  ;;  %v816_v0 = vsub.s32 0, %v814_v31  ;;  %vm713_vm7 = vcmp.le.f32.partialorder %v712_v34, 0.7853982  ;;  %v692_v20 = vperm.slane %v1450_v56, 5 }
  0x7c   :  { %v664_v26 = vadd.f32 %v663_v10, %v661_v2  ;;  %v667_v46 = vsub.f32 %v665_v47, %v666_v35  ;;  %v694_v5 = vperm.slane %v1448_v23, 5  ;;  %v837_v8 = vsel %vm714_vm6, %v836_v7, %v1456_v14 }
  0x7d   :  { %v817_v19 = vsel %vm815_vm14, %v816_v0, %v814_v31  ;;  %v1464_v27 = vpop.eup %1093  ;;  %v839_v18 = vsel %vm713_vm7, 0, %v837_v8  ;;  %v1045_v10 = vsub.f32 0.0, %v1261_v50  ;;  %v700_v14 = vperm.slane %v1448_v23, 6 }
  0x7e   :  { %v818_v30 = vclz %v817_v19  ;;  %v673_v37 = vmul.f32 %v670_v32, %v664_v26  ;;  %v680_v38 = vperm.slane %v1464_v27, 3  ;;  %v669_v58 = vmul.f32 %v668_v16, %v664_v26 }
  0x7f   :  { %v1010_v28 = vadd.s32 3, %v839_v18  ;;  %v702_v1 = vperm.slane %v1450_v56, 6  ;;  %vm855_vm1 = vweird.f32 %v1261_v50 }
  0x80   :  { %v1081_v51 = vadd.s32 4294967294, %v818_v30  ;;  %v675_v57 = vadd.f32 %v674_v39, %v673_v37  ;;  %v683_v62 = vmul.f32 %v680_v38, %v667_v46  ;;  %v672_v3 = vsub.f32 %v669_v58, %v671_v21 }
  0x81   :  { %v1011_v35 = vand.u32 3, %v1010_v28  ;;  %v1046_v39 = vmul.f32 %v1045_v10, %v1261_v50 }
  0x82   :  { %vm1082_vm5 = vcmp.lt.s32.totalorder %v1081_v51, 0  ;;  %v682_v59 = vmul.f32 %v680_v38, %v675_v57  ;;  %v690_v45 = vmul.f32 %v684_v22, %v683_v62  ;;  %v681_v24 = vmul.f32 %v680_v38, %v672_v3 }
  0x83   :  { %v821_v43 = vsel %vm1082_vm5, 0, %v1081_v51  ;;  %v687_v29 = vmul.f32 %v686_v25, %v683_v62  ;;  %v856_v51 = vand.u32 3, %v839_v18  ;;  %vm1016_vm9 = vcmp.eq.s32.totalorder %v1011_v35, 2 }
  0x84   :  { %v822_v4 = vsub.s32 32, %v821_v43  ;;  %v823_v41 = vshll.u32 %v814_v31, %v821_v43  ;;  %v826_v42 = vsub.s32 4294967266, %v821_v43  ;;  %v689_v6 = vmul.f32 %v686_v25, %v682_v59 }
  0x85   :  { %v685_v17 = vmul.f32 %v684_v22, %v682_v59  ;;  %v695_v34 = vmul.f32 %v694_v5, %v681_v24  ;;  %v698_v32 = vmul.f32 %v692_v20, %v681_v24  ;;  %vm861_vm8 = vcmp.eq.s32.totalorder %v856_v51, 2 }
  0x86   :  { %v824_v44 = vshrl.u32 %v806_v36, %v822_v4  ;;  %v827_v33 = vadd.s32 127, %v826_v42  ;;  %v691_v60 = vadd.f32 %v690_v45, %v689_v6  ;;  %v1047_v38 = vmul.f32 1.442695, %v1046_v39 }
  0x87   :  { %v688_v19 = vsub.f32 %v685_v17, %v687_v29  ;;  %vm857_vm12 = vcmp.lt.s32.totalorder %v856_v51, 2  ;;  %vm858_vm10 = vcmp.eq.s32.totalorder %v856_v51, 0  ;;  %vm1013_vm15 = vcmp.eq.s32.totalorder %v1011_v35, 0 }
  0x88   :  { %v825_v48 = vor.u32 %v824_v44, %v823_v41  ;;  %v828_v52 = vshll.u32 %v827_v33, 23  ;;  %v693_v31 = vmul.f32 %v692_v20, %v691_v60  ;;  %v697_v36 = vmul.f32 %v694_v5, %v691_v60 }
  0x89   :  { %v706_v4 = vmul.f32 %v700_v14, %v688_v19  ;;  %v708_v41 = vperm.slane %v1464_v27, 7  ;;  %v703_v23 = vmul.f32 %v702_v1, %v688_v19  ;;  %vm1012_vm0 = vcmp.lt.s32.totalorder %v1011_v35, 2 }
  0x8a   :  { %v829_v54 = vor.u32 4788187, %v828_v52  ;;  %v832_v9 = vcvt.s32.f32 %v825_v48  ;;  %v696_v30 = vadd.f32 %v695_v34, %v693_v31  ;;  %v699_v56 = vsub.f32 %v697_v36, %v698_v32 }
  0x8b   :  { %1095 = vpow2.f32 %v1047_v38 }
  0x8c   :  { %v830_v63 = vand.u32 2147483647, %v829_v54  ;;  %v705_v43 = vmul.f32 %v702_v1, %v696_v30  ;;  %v701_v33 = vmul.f32 %v700_v14, %v696_v30  ;;  %v711_v21 = vmul.f32 %v708_v41, %v699_v56 }
  0x8e   :  { %v833_v55 = vmul.f32 %v832_v9, %v830_v63  ;;  %v707_v48 = vadd.f32 %v706_v4, %v705_v43  ;;  %v704_v54 = vsub.f32 %v701_v33, %v703_v23 }
  0x90   :  { %v834_v61 = vxor.u32 2147483648, %v833_v55  ;;  %v710_v58 = vmul.f32 %v708_v41, %v707_v48  ;;  %v709_v3 = vmul.f32 %v708_v41, %v704_v54 }
  0x91   :  { %v1096_v60 = vpop.eup %1095 }
  0x92   :  { %v835_v53 = vsel %vm714_vm6, %v834_v61, %v833_v55  ;;  %v1049_v29 = vperm.slane %v1096_v60, 3 }
  0x93   :  { %v838_v11 = vsel %vm713_vm7, %v1261_v50, %v835_v53 }
  0x94   :  { %v840_v49 = vmul.f32 %v838_v11, %v838_v11 }
  0x96   :  { %v841_v40 = vmul.f32 -0.001358992, %v840_v49  ;;  %v848_v15 = vmul.f32 -0.00019511016, %v840_v49 }
  0x98   :  { %v842_v12 = vadd.f32 0.041655596, %v841_v40  ;;  %v849_v0 = vadd.f32 0.008332121, %v848_v15 }
  0x9a   :  { %v843_v13 = vmul.f32 %v842_v12, %v840_v49  ;;  %v850_v2 = vmul.f32 %v849_v0, %v840_v49 }
  0x9c   :  { %v844_v26 = vadd.f32 -0.4999988, %v843_v13  ;;  %v851_v16 = vadd.f32 -0.16666654, %v850_v2 }
  0x9e   :  { %v845_v47 = vmul.f32 %v844_v26, %v840_v49  ;;  %v852_v37 = vmul.f32 %v851_v16, %v840_v49 }
  0xa0   :  { %v846_v42 = vadd.f32 1.0, %v845_v47  ;;  %v853_v44 = vadd.f32 1.0, %v852_v37 }
  0xa2   :  { %v854_v46 = vmul.f32 %v853_v44, %v838_v11  ;;  %v862_v57 = vxor.u32 2147483648, %v846_v42 }
  0xa4   :  { %v859_v52 = vxor.u32 2147483648, %v854_v46  ;;  %v863_v22 = vsel %vm861_vm8, %v862_v57, %v854_v46  ;;  %v1018_v25 = vsel %vm1016_vm9, %v862_v57, %v854_v46 }
  0xa6   :  { %v860_v27 = vsel %vm858_vm10, %v846_v42, %v859_v52  ;;  %v1015_v9 = vsel %vm1013_vm15, %v846_v42, %v859_v52 }
  0xa7   :  { %v864_v59 = vsel %vm857_vm12, %v860_v27, %v863_v22  ;;  %v1019_v62 = vsel %vm1012_vm0, %v1015_v9, %v1018_v25 }
  0xa8   :  { %v865_v63 = vsel %vm855_vm1, nan, %v864_v59  ;;  %v1020_v55 = vsel %vm855_vm1, nan, %v1019_v62 }
  0xa9   :  { %v1021_v6 = vperm.slane %v865_v63, 0  ;;  %v1023_v45 = vperm.slane %v1020_v55, 0  ;;  %v1031_v7 = vperm.slane %v865_v63, 1  ;;  %v1029_v61 = vperm.slane %v1020_v55, 1 }
  0xaa   :  { %v1037_v50 = vperm.slane %v865_v63, 2  ;;  %v1039_v17 = vperm.slane %v1020_v55, 2  ;;  %v1055_v10 = vperm.slane %v865_v63, 4  ;;  %v1053_v14 = vperm.slane %v1020_v55, 4 }
  0xab   :  { %v1022_v20 = vmul.f32 %v1021_v6, %v710_v58  ;;  %v1024_v5 = vmul.f32 %v1023_v45, %v711_v21  ;;  %v1026_v53 = vmul.f32 %v1023_v45, %v710_v58  ;;  %v1027_v24 = vmul.f32 %v1021_v6, %v711_v21 }
  0xac   :  { %v1032_v49 = vmul.f32 %v1031_v7, %v709_v3  ;;  %v1035_v18 = vmul.f32 %v1029_v61, %v709_v3  ;;  %v1060_v32 = vperm.slane %v1020_v55, 5  ;;  %v1058_v35 = vperm.slane %v865_v63, 5 }
  0xad   :  { %v1025_v8 = vsub.f32 %v1022_v20, %v1024_v5  ;;  %v1028_v11 = vadd.f32 %v1027_v24, %v1026_v53 }
  0xaf   :  { %v1030_v40 = vmul.f32 %v1029_v61, %v1028_v11  ;;  %v1034_v15 = vmul.f32 %v1031_v7, %v1028_v11  ;;  %v1040_v12 = vmul.f32 %v1039_v17, %v1025_v8  ;;  %v1043_v0 = vmul.f32 %v1037_v50, %v1025_v8 }
  0xb1   :  { %v1033_v31 = vadd.f32 %v1032_v49, %v1030_v40  ;;  %v1036_v34 = vsub.f32 %v1034_v15, %v1035_v18 }
  0xb3   :  { %v1038_v28 = vmul.f32 %v1037_v50, %v1033_v31  ;;  %v1042_v13 = vmul.f32 %v1039_v17, %v1033_v31  ;;  %v1052_v2 = vmul.f32 %v1049_v29, %v1036_v34 }
  0xb5   :  { %v1041_v19 = vsub.f32 %v1038_v28, %v1040_v12  ;;  %v1044_v30 = vadd.f32 %v1043_v0, %v1042_v13  ;;  %v1056_v16 = vmul.f32 %v1055_v10, %v1052_v2 }
  0xb7   :  { %v1050_v1 = vmul.f32 %v1049_v29, %v1041_v19  ;;  %v1051_v26 = vmul.f32 %v1049_v29, %v1044_v30 }
  0xb9   :  { %v1054_v51 = vmul.f32 %v1053_v14, %v1051_v26  ;;  %v1061_v47 = vmul.f32 %v1060_v32, %v1050_v1 }
  0xbb   :  { %v1057_v36 = vadd.f32 %v1056_v16, %v1054_v51 }
  0xbd   :  { %v1059_v37 = vmul.f32 %v1058_v35, %v1057_v36 }
  0xbf   :  { %v1062_v39 = vsub.f32 %v1059_v37, %v1061_v47 }
  0xc1   :  { %1063 = vst [vmem:[%s1488_s2] sm:$0xff] %v1062_v39 }

</bundles_post_ra>
